<compile_context>
chip_gen: v7x
topology: tpu7x:2x2x1
jax: 0.10.0
libtpu: 0.0.40
codegen_flags: <defaults>
</compile_context>

<pallas_src>
import math
import functools

import numpy as np
import jax
import jax.numpy as jnp
from jax.experimental import pallas as pl
from jax.experimental.pallas import tpu as pltpu

TIMESTEPS    = 100
MAX_MSAS     = 256   # self.max_msas
MAX_OUTLIERS = 128   # self.max_outliers
TOKEN_DIM    = 2     # self.in_channels
HIDDEN       = 32


def _cosine_variance_schedule_np(timesteps, epsilon=0.008):
    steps = np.linspace(0.0, timesteps, timesteps + 1, dtype=np.float32)
    f_t = np.cos((steps / timesteps + epsilon) / (1.0 + epsilon) * math.pi * 0.5) ** 2
    betas = np.clip(1.0 - f_t[1:] / f_t[:timesteps], 0.0, 0.999)
    return betas.astype(np.float32)


def _msa_kernel(B, N, inv_T,
                t_ref,       # SMEM (B,) int32   scalar-prefetched diffusion steps
                x_ref,       # VMEM (C, B*N)     lane-dense token slab
                w1t_ref,     # VMEM (H, C)       shared point-MLP weight (column form)
                w2t_ref,     # VMEM (H, H)       PointTransformer hidden mixing
                wc8_ref,     # VMEM (8, H)       stacked classifier head (rows 0..1 used)
                wcols_ref,   # VMEM (H, 8)       packed: b1|wt|temb|b2|bc8|bt|0|0
                predt_ref,   # OUT  (1, B)       pred_t per sample
                label_ref):  # OUT  (8, B*N)     rows 0..1 are the class logits
    f32 = jnp.float32
    BN = B * N
    C = x_ref.shape[0]

    # packed parameter slab (all static slices -> free views)
    b1   = wcols_ref[:, 0:1]      # (H, 1)
    wt   = wcols_ref[:, 1:2]      # (H, 1)  DGCNN_cls regression head
    temb = wcols_ref[:, 2:3]      # (H, 1)  time-embedding direction
    b2   = wcols_ref[:, 3:4]      # (H, 1)
    bc8  = wcols_ref[0:8, 4:5]    # (8, 1)  classifier biases (rows 0..1 used)
    bt   = wcols_ref[0:1, 5:6]    # (1, 1)

    # ---- shared per-point lift: K=C=2 -> VPU broadcast FMAs, whole batch ----
    acc = b1                                                        # (H, 1)
    for c in range(C):
        acc = acc + w1t_ref[:, c:c + 1] * x_ref[c:c + 1, :].astype(f32)
    h = jnp.maximum(acc, 0.0)                                       # (H, B*N)

    # ---- per-lane t/T row built from SMEM scalars (no VMEM t operand) -------
    tn0 = t_ref[0].astype(f32) * inv_T
    t_row = jnp.full((1, BN), tn0, dtype=f32)                       # (1, B*N)
    if B > 1:
        lane = jax.lax.broadcasted_iota(jnp.int32, (1, BN), 1)
        for b in range(1, B):
            tnb = t_ref[b].astype(f32) * inv_T
            t_row = jnp.where(lane >= b * N, tnb, t_row)

    # ---- PointTransformer stand-in: ONE batched MXU matmul ------------------
    h2 = jnp.maximum(
        jnp.dot(w2t_ref[...], h, preferred_element_type=f32)        # (H, B*N)
        + b2 + temb * t_row,
        0.0)

    # ---- stacked classifier head on the MXU + dense unmasked slab store -----
    label_ref[...] = (
        jnp.dot(wc8_ref[...], h2, preferred_element_type=f32) + bc8)  # (8, B*N)

    # ---- DGCNN_cls stand-in: per-sample max-pool + sigmoid head (XLU/EUP) ---
    for b in range(B):
        hb = h[:, b * N:(b + 1) * N]                                 # lane-aligned view
        g = jnp.max(hb, axis=1, keepdims=True)                       # (H, 1)
        s = jnp.sum(g * wt, axis=0, keepdims=True) + bt              # (1, 1)
        predt_ref[0:1, b:b + 1] = jax.nn.sigmoid(s)


@functools.partial(jax.jit, static_argnames=("timesteps",))
def msa_forward_networks(x_cbn, t_i32, params, *, timesteps):
    """Runs both sub-networks in one fused Pallas kernel.

    x_cbn : (C, B*N) float32 lane-dense token slab (pad value 1)
    t_i32 : (B,) int32 diffusion steps
    returns (pred_t (B,), pred_label (B, 2, N))
    """
    C, BN = x_cbn.shape
    B = int(t_i32.shape[0])
    N = BN // B
    H = params["w2t"].shape[0]

    grid_spec = pltpu.PrefetchScalarGridSpec(
        num_scalar_prefetch=1,                       # t -> SMEM
        grid=(1,),                                   # whole batch in one step
        in_specs=[
            pl.BlockSpec((C, BN), lambda i, t: (0, 0)),   # token slab
            pl.BlockSpec((H, C),  lambda i, t: (0, 0)),   # w1t
            pl.BlockSpec((H, H),  lambda i, t: (0, 0)),   # w2t
            pl.BlockSpec((8, H),  lambda i, t: (0, 0)),   # stacked classifier
            pl.BlockSpec((H, 8),  lambda i, t: (0, 0)),   # packed small params
        ],
        out_specs=[
            pl.BlockSpec((1, B),  lambda i, t: (0, 0)),   # pred_t
            pl.BlockSpec((8, BN), lambda i, t: (0, 0)),   # dense logits slab
        ],
    )

    predt, label8 = pl.pallas_call(
        functools.partial(_msa_kernel, B, N, 1.0 / float(timesteps)),
        grid_spec=grid_spec,
        out_shape=(
            jax.ShapeDtypeStruct((1, B), jnp.float32),
            jax.ShapeDtypeStruct((8, BN), jnp.float32),
        ),
        compiler_params=pltpu.CompilerParams(dimension_semantics=("arbitrary",)),
    )(t_i32, x_cbn, params["w1t"], params["w2t"], params["wc8"], params["wcols"])

    pred_t = predt[0, :]                                        # (B,)
    pred_label = label8[0:2, :].reshape(2, B, N).transpose(1, 0, 2)  # (B, 2, N)
    return pred_t, pred_label


class Model:
    """JAX/Pallas port of the PyTorch Model (training branch)."""

    def __init__(self, timesteps, key, host_seed=0):
        self.timesteps = timesteps
        self.in_channels = TOKEN_DIM
        self.max_outliers = MAX_OUTLIERS
        self.max_msas = MAX_MSAS

        betas = _cosine_variance_schedule_np(timesteps)
        alphas = 1.0 - betas
        alphas_cumprod = np.cumprod(alphas).astype(np.float32)
        self._somac_np = np.sqrt(1.0 - alphas_cumprod).astype(np.float32)
        self.alphas_cumprod = jnp.asarray(alphas_cumprod)
        self.sqrt_one_minus_alphas_cumprod = jnp.asarray(self._somac_np)

        # host RNG for t / permutations: zero device->host syncs per step
        # (statistically equivalent to torch.randint/randperm, not bit-identical)
        self._rng = np.random.default_rng(host_seed)

        ks = jax.random.split(key, 5)
        H, C = HIDDEN, TOKEN_DIM

        def w(k, shape, scale):
            return (scale * jax.random.normal(k, shape)).astype(jnp.float32)

        w1t  = w(ks[0], (H, C), 0.5)       # shared point MLP (column form)
        wt   = w(ks[1], (H, 1), 0.2)       # DGCNN_cls regression head
        temb = w(ks[2], (H, 1), 0.2)       # time embedding
        w2t  = w(ks[3], (H, H), 0.2)       # PointTransformer hidden mixing
        wc   = w(ks[4], (2, H), 0.2)       # per-point classifier head (2 classes)
        wc8  = jnp.zeros((8, H), jnp.float32).at[0:2, :].set(wc)

        zcol = jnp.zeros((H, 1), jnp.float32)
        # columns: b1 | wt | temb | b2 | bc8(rows 0..1) | bt(row 0) | pad | pad
        wcols = jnp.concatenate(
            [zcol, wt, temb, zcol, zcol, zcol, zcol, zcol], axis=1)  # (H, 8)

        self.params = dict(w1t=w1t, w2t=w2t, wc8=wc8, wcols=wcols)

    def forward_training(self, good_tokens, bad_tokens):
        """Mirrors Model.forward(..., training=True).

        good_tokens / bad_tokens: lists of host (numpy) arrays of shape
        (n_i, in_channels).  All ragged prep (outlier mixing, shuffles, padding)
        is host-side NumPy; only the final (C, B*N) slab, the (B,) steps and the
        (B, N) labels touch the device.  The fused Pallas kernel runs both
        sub-network forward passes.
        """
        bs = len(good_tokens)
        good_np = [np.asarray(g, dtype=np.float32) for g in good_tokens]
        bad_np  = [np.asarray(b, dtype=np.float32) for b in bad_tokens]

        t_np = self._rng.integers(0, self.timesteps, size=bs).astype(np.int32)
        ratio_np = self._somac_np[t_np]                      # (bs,)

        C, N = self.in_channels, self.max_msas
        x_np = np.ones((C, bs * N), np.float32)              # pad value 1
        labels_np = np.full((bs, N), -1, np.int32)           # pad value -1
        for i in range(bs):
            good_i, bad_i = good_np[i], bad_np[i]
            good_num = good_i.shape[0]
            outlier_num = int(self.max_outliers * float(ratio_np[i]))

            perm_bad = self._rng.permutation(bad_i.shape[0])
            noise_matches = bad_i[perm_bad][:outlier_num]

            tok = np.concatenate([good_i, noise_matches], axis=0)
            if tok.shape[0] > self.max_msas:
                tok = tok[: self.max_msas]
            mask = np.zeros((tok.shape[0],), np.float32)
            mask[good_num:] = 1.0

            perm = self._rng.permutation(tok.shape[0])
            tok, mask = tok[perm], mask[perm]

            n = tok.shape[0]
            x_np[:, i * N:i * N + n] = tok.T                 # (C, n) into the slab
            labels_np[i, :n] = mask.astype(np.int32)

        x = jnp.asarray(x_np)                                # (C, B*N)
        t_i32 = jnp.asarray(t_np)                            # (B,)
        gt_label = jnp.asarray(labels_np)                    # (B, N)
        gt_t = jnp.asarray((t_np.astype(np.float32) / float(self.timesteps)))

        # hot path: DGCNN_cls + PointTransformer stand-ins fused in one kernel
        pred_t, pred_label = msa_forward_networks(
            x, t_i32, self.params, timesteps=self.timesteps)
        return pred_label, gt_label, pred_t, gt_t


if __name__ == "__main__":
    key = jax.random.PRNGKey(0)
    k_model, k_data = jax.random.split(key)

    model = Model(TIMESTEPS, k_model)

    bs = 2
    good_lens = [40, 60]
    bad_lens = [150, 150]
    kd = jax.random.split(k_data, 2 * bs)
    # token lists are pinned on host as numpy ONCE (setup-time transfer); the
    # training step itself then has no device->host syncs in the data prep.
    good_tokens = [
        np.asarray(jax.random.randint(kd[i], (good_lens[i], TOKEN_DIM), 0, 21),
                   dtype=np.float32)
        for i in range(bs)
    ]
    bad_tokens = [
        np.asarray(jax.random.randint(kd[bs + i], (bad_lens[i], TOKEN_DIM), 0, 21),
                   dtype=np.float32)
        for i in range(bs)
    ]

    pred_label, gt_label, pred_t, gt_t = model.forward_training(good_tokens, bad_tokens)
    jax.block_until_ready((pred_label, pred_t))

    assert pred_label.shape == (bs, 2, MAX_MSAS)
    assert gt_label.shape == (bs, MAX_MSAS)
    assert pred_t.shape == (bs,)
    assert gt_t.shape == (bs,)
    assert bool(jnp.all(jnp.isfinite(pred_label)))
    assert bool(jnp.all((pred_t >= 0.0) & (pred_t <= 1.0)))

    print("KERNEL_OK")
</pallas_src>

<mosaic_0001>
module attributes {stable_mosaic.version = 11 : i64} {
  func.func @_msa_kernel(%arg0: i32, %arg1: memref<2xi32, #tpu.memory_space<smem>>, %arg2: memref<2x512xf32, #tpu.memory_space<vmem>>, %arg3: memref<32x2xf32, #tpu.memory_space<vmem>>, %arg4: memref<32x32xf32, #tpu.memory_space<vmem>>, %arg5: memref<8x32xf32, #tpu.memory_space<vmem>>, %arg6: memref<32x8xf32, #tpu.memory_space<vmem>>, %arg7: memref<1x2xf32, #tpu.memory_space<vmem>>, %arg8: memref<8x512xf32, #tpu.memory_space<vmem>>) attributes {dimension_semantics = [#tpu.dimension_semantics<arbitrary>], iteration_bounds = array<i64: 1>, scalar_prefetch = 1 : i64, scratch_operands = 0 : i64, tpu.core_type = #tpu.core_type<tc>, window_params = [{pipeline_mode = #tpu.pipeline_mode<synchronous>, transform_indices = @transform_0, window_bounds = array<i64: 2, 512>}, {pipeline_mode = #tpu.pipeline_mode<synchronous>, transform_indices = @transform_1, window_bounds = array<i64: 32, 2>}, {pipeline_mode = #tpu.pipeline_mode<synchronous>, transform_indices = @transform_2, window_bounds = array<i64: 32, 32>}, {pipeline_mode = #tpu.pipeline_mode<synchronous>, transform_indices = @transform_3, window_bounds = array<i64: 8, 32>}, {pipeline_mode = #tpu.pipeline_mode<synchronous>, transform_indices = @transform_4, window_bounds = array<i64: 32, 8>}, {pipeline_mode = #tpu.pipeline_mode<synchronous>, transform_indices = @transform_5, window_bounds = array<i64: 1, 2>}, {pipeline_mode = #tpu.pipeline_mode<synchronous>, transform_indices = @transform_6, window_bounds = array<i64: 8, 512>}]} {
    %c0 = arith.constant 0 : index
    %c0_0 = arith.constant 0 : index
    %0 = vector.load %arg6[%c0, %c0_0] : memref<32x8xf32, #tpu.memory_space<vmem>>, vector<32x1xf32>
    %c0_1 = arith.constant 0 : index
    %c1 = arith.constant 1 : index
    %1 = vector.load %arg6[%c0_1, %c1] : memref<32x8xf32, #tpu.memory_space<vmem>>, vector<32x1xf32>
    %c0_2 = arith.constant 0 : index
    %c2 = arith.constant 2 : index
    %2 = vector.load %arg6[%c0_2, %c2] : memref<32x8xf32, #tpu.memory_space<vmem>>, vector<32x1xf32>
    %c0_3 = arith.constant 0 : index
    %c3 = arith.constant 3 : index
    %3 = vector.load %arg6[%c0_3, %c3] : memref<32x8xf32, #tpu.memory_space<vmem>>, vector<32x1xf32>
    %c0_4 = arith.constant 0 : index
    %c4 = arith.constant 4 : index
    %4 = vector.load %arg6[%c0_4, %c4] : memref<32x8xf32, #tpu.memory_space<vmem>>, vector<8x1xf32>
    %c0_5 = arith.constant 0 : index
    %c5 = arith.constant 5 : index
    %5 = vector.load %arg6[%c0_5, %c5] : memref<32x8xf32, #tpu.memory_space<vmem>>, vector<1x1xf32>
    %c0_6 = arith.constant 0 : index
    %c0_7 = arith.constant 0 : index
    %6 = vector.load %arg3[%c0_6, %c0_7] : memref<32x2xf32, #tpu.memory_space<vmem>>, vector<32x1xf32>
    %c0_8 = arith.constant 0 : index
    %c0_9 = arith.constant 0 : index
    %7 = vector.load %arg2[%c0_8, %c0_9] : memref<2x512xf32, #tpu.memory_space<vmem>>, vector<1x512xf32>
    %8 = vector.broadcast %6 : vector<32x1xf32> to vector<32x512xf32>
    %9 = vector.broadcast %7 : vector<1x512xf32> to vector<32x512xf32>
    %10 = arith.mulf %8, %9 : vector<32x512xf32>
    %11 = vector.broadcast %0 : vector<32x1xf32> to vector<32x512xf32>
    %12 = arith.addf %11, %10 : vector<32x512xf32>
    %c0_10 = arith.constant 0 : index
    %c1_11 = arith.constant 1 : index
    %13 = vector.load %arg3[%c0_10, %c1_11] : memref<32x2xf32, #tpu.memory_space<vmem>>, vector<32x1xf32>
    %c1_12 = arith.constant 1 : index
    %c0_13 = arith.constant 0 : index
    %14 = vector.load %arg2[%c1_12, %c0_13] : memref<2x512xf32, #tpu.memory_space<vmem>>, vector<1x512xf32>
    %15 = vector.broadcast %13 : vector<32x1xf32> to vector<32x512xf32>
    %16 = vector.broadcast %14 : vector<1x512xf32> to vector<32x512xf32>
    %17 = arith.mulf %15, %16 : vector<32x512xf32>
    %18 = arith.addf %12, %17 : vector<32x512xf32>
    %cst = arith.constant 0.000000e+00 : f32
    %19 = vector.broadcast %cst : f32 to vector<32x512xf32>
    %20 = arith.maximumf %18, %19 : vector<32x512xf32>
    %c0_14 = arith.constant 0 : index
    %21 = memref.load %arg1[%c0_14] : memref<2xi32, #tpu.memory_space<smem>>
    %22 = arith.sitofp %21 : i32 to f32
    %cst_15 = arith.constant 0.00999999977 : f32
    %23 = arith.mulf %22, %cst_15 : f32
    %24 = vector.broadcast %23 : f32 to vector<1x512xf32>
    %25 = tpu.iota {dimensions = array<i32: 1>} : vector<1x512xi32>
    %c1_16 = arith.constant 1 : index
    %26 = memref.load %arg1[%c1_16] : memref<2xi32, #tpu.memory_space<smem>>
    %27 = arith.sitofp %26 : i32 to f32
    %cst_17 = arith.constant 0.00999999977 : f32
    %28 = arith.mulf %27, %cst_17 : f32
    %c256_i32 = arith.constant 256 : i32
    %29 = vector.broadcast %c256_i32 : i32 to vector<1x512xi32>
    %30 = arith.cmpi sge, %25, %29 : vector<1x512xi32>
    %31 = vector.broadcast %28 : f32 to vector<1x512xf32>
    %32 = arith.select %30, %31, %24 : vector<1x512xi1>, vector<1x512xf32>
    %c0_18 = arith.constant 0 : index
    %c0_19 = arith.constant 0 : index
    %33 = vector.load %arg4[%c0_18, %c0_19] : memref<32x32xf32, #tpu.memory_space<vmem>>, vector<32x32xf32>
    %cst_20 = arith.constant dense<0.000000e+00> : vector<32x512xf32>
    %34 = tpu.matmul %33, %20, %cst_20 {dimension_numbers = #tpu.dot_dimension_numbers<[1], [0], [0], [1], [0, 0, 1, 1], [], []>} : vector<32x32xf32>, vector<32x512xf32>, vector<32x512xf32> -> vector<32x512xf32>
    %35 = vector.broadcast %3 : vector<32x1xf32> to vector<32x512xf32>
    %36 = arith.addf %34, %35 : vector<32x512xf32>
    %37 = vector.broadcast %2 : vector<32x1xf32> to vector<32x512xf32>
    %38 = vector.broadcast %32 : vector<1x512xf32> to vector<32x512xf32>
    %39 = arith.mulf %37, %38 : vector<32x512xf32>
    %40 = arith.addf %36, %39 : vector<32x512xf32>
    %cst_21 = arith.constant 0.000000e+00 : f32
    %41 = vector.broadcast %cst_21 : f32 to vector<32x512xf32>
    %42 = arith.maximumf %40, %41 : vector<32x512xf32>
    %c0_22 = arith.constant 0 : index
    %c0_23 = arith.constant 0 : index
    %43 = vector.load %arg5[%c0_22, %c0_23] : memref<8x32xf32, #tpu.memory_space<vmem>>, vector<8x32xf32>
    %cst_24 = arith.constant dense<0.000000e+00> : vector<8x512xf32>
    %44 = tpu.matmul %43, %42, %cst_24 {dimension_numbers = #tpu.dot_dimension_numbers<[1], [0], [0], [1], [0, 0, 1, 1], [], []>} : vector<8x32xf32>, vector<32x512xf32>, vector<8x512xf32> -> vector<8x512xf32>
    %45 = vector.broadcast %4 : vector<8x1xf32> to vector<8x512xf32>
    %46 = arith.addf %44, %45 : vector<8x512xf32>
    %c0_25 = arith.constant 0 : index
    %c0_26 = arith.constant 0 : index
    %47 = vector.load %arg8[%c0_25, %c0_26] : memref<8x512xf32, #tpu.memory_space<vmem>>, vector<8x512xf32>
    tpu.vector_store %arg8[%c0_25, %c0_26], %46 {strides = array<i32>} : memref<8x512xf32, #tpu.memory_space<vmem>>, vector<8x512xf32>,
    %48 = vector.extract_strided_slice %20 {offsets = [0, 0], sizes = [32, 256], strides = [1, 1]} : vector<32x512xf32> to vector<32x256xf32>
    %cst_27 = arith.constant dense<0xFF800000> : vector<32xf32>
    %49 = vector.multi_reduction <maximumf>, %48, %cst_27 [1] : vector<32x256xf32> to vector<32xf32>
    %50 = vector.shape_cast %49 : vector<32xf32> to vector<32x1xf32>
    %51 = arith.mulf %50, %1 : vector<32x1xf32>
    %cst_28 = arith.constant dense<0.000000e+00> : vector<1xf32>
    %52 = vector.multi_reduction <add>, %51, %cst_28 [0] : vector<32x1xf32> to vector<1xf32>
    %53 = vector.shape_cast %52 : vector<1xf32> to vector<1x1xf32>
    %54 = arith.addf %53, %5 : vector<1x1xf32>
    %55 = arith.negf %54 : vector<1x1xf32>
    %56 = math.exp %55 : vector<1x1xf32>
    %cst_29 = arith.constant 1.000000e+00 : f32
    %57 = vector.broadcast %cst_29 : f32 to vector<1x1xf32>
    %58 = arith.addf %57, %56 : vector<1x1xf32>
    %59 = arith.divf %57, %58 : vector<1x1xf32>
    %c0_30 = arith.constant 0 : index
    %c0_31 = arith.constant 0 : index
    %60 = vector.load %arg7[%c0_30, %c0_31] : memref<1x2xf32, #tpu.memory_space<vmem>>, vector<1x1xf32>
    tpu.vector_store %arg7[%c0_30, %c0_31], %59 {strides = array<i32>} : memref<1x2xf32, #tpu.memory_space<vmem>>, vector<1x1xf32>,
    %61 = vector.extract_strided_slice %20 {offsets = [0, 256], sizes = [32, 256], strides = [1, 1]} : vector<32x512xf32> to vector<32x256xf32>
    %cst_32 = arith.constant dense<0xFF800000> : vector<32xf32>
    %62 = vector.multi_reduction <maximumf>, %61, %cst_32 [1] : vector<32x256xf32> to vector<32xf32>
    %63 = vector.shape_cast %62 : vector<32xf32> to vector<32x1xf32>
    %64 = arith.mulf %63, %1 : vector<32x1xf32>
    %cst_33 = arith.constant dense<0.000000e+00> : vector<1xf32>
    %65 = vector.multi_reduction <add>, %64, %cst_33 [0] : vector<32x1xf32> to vector<1xf32>
    %66 = vector.shape_cast %65 : vector<1xf32> to vector<1x1xf32>
    %67 = arith.addf %66, %5 : vector<1x1xf32>
    %68 = arith.negf %67 : vector<1x1xf32>
    %69 = math.exp %68 : vector<1x1xf32>
    %cst_34 = arith.constant 1.000000e+00 : f32
    %70 = vector.broadcast %cst_34 : f32 to vector<1x1xf32>
    %71 = arith.addf %70, %69 : vector<1x1xf32>
    %72 = arith.divf %70, %71 : vector<1x1xf32>
    %c0_35 = arith.constant 0 : index
    %c1_36 = arith.constant 1 : index
    %73 = vector.load %arg7[%c0_35, %c1_36] : memref<1x2xf32, #tpu.memory_space<vmem>>, vector<1x1xf32>
    tpu.vector_store %arg7[%c0_35, %c1_36], %72 {strides = array<i32>} : memref<1x2xf32, #tpu.memory_space<vmem>>, vector<1x1xf32>,
    return
  }
  func.func @transform_0(%arg0: i32, %arg1: memref<2xi32, #tpu.memory_space<smem>>) -> (i32, i32) {
    %c0_i32 = arith.constant 0 : i32
    %c0_i32_0 = arith.constant 0 : i32
    %c0_i32_1 = arith.constant 0 : i32
    return %c0_i32, %c0_i32_0 : i32, i32
  }
  func.func @transform_1(%arg0: i32, %arg1: memref<2xi32, #tpu.memory_space<smem>>) -> (i32, i32) {
    %c0_i32 = arith.constant 0 : i32
    %c0_i32_0 = arith.constant 0 : i32
    %c0_i32_1 = arith.constant 0 : i32
    return %c0_i32, %c0_i32_0 : i32, i32
  }
  func.func @transform_2(%arg0: i32, %arg1: memref<2xi32, #tpu.memory_space<smem>>) -> (i32, i32) {
    %c0_i32 = arith.constant 0 : i32
    %c0_i32_0 = arith.constant 0 : i32
    %c0_i32_1 = arith.constant 0 : i32
    return %c0_i32, %c0_i32_0 : i32, i32
  }
  func.func @transform_3(%arg0: i32, %arg1: memref<2xi32, #tpu.memory_space<smem>>) -> (i32, i32) {
    %c0_i32 = arith.constant 0 : i32
    %c0_i32_0 = arith.constant 0 : i32
    %c0_i32_1 = arith.constant 0 : i32
    return %c0_i32, %c0_i32_0 : i32, i32
  }
  func.func @transform_4(%arg0: i32, %arg1: memref<2xi32, #tpu.memory_space<smem>>) -> (i32, i32) {
    %c0_i32 = arith.constant 0 : i32
    %c0_i32_0 = arith.constant 0 : i32
    %c0_i32_1 = arith.constant 0 : i32
    return %c0_i32, %c0_i32_0 : i32, i32
  }
  func.func @transform_5(%arg0: i32, %arg1: memref<2xi32, #tpu.memory_space<smem>>) -> (i32, i32) {
    %c0_i32 = arith.constant 0 : i32
    %c0_i32_0 = arith.constant 0 : i32
    %c0_i32_1 = arith.constant 0 : i32
    return %c0_i32, %c0_i32_0 : i32, i32
  }
  func.func @transform_6(%arg0: i32, %arg1: memref<2xi32, #tpu.memory_space<smem>>) -> (i32, i32) {
    %c0_i32 = arith.constant 0 : i32
    %c0_i32_0 = arith.constant 0 : i32
    %c0_i32_1 = arith.constant 0 : i32
    return %c0_i32, %c0_i32_0 : i32, i32
  }
}

</mosaic_0001>

<bundles_post_ra>
// kernel: msa_forward_networks.1
= control target key start
LH: loop header
LB: loop body
LE: loop exit
PB: predicated region body
PF: predicated region fallthrough
CT: control target
= control target key end

     0   :  { %s1179_s0 = inlined_call_operand.vmem [shape: s32[2], index: 0, kind: input, shape index: {}]   ;;  %s1180_s1 = inlined_call_operand.vmem [shape: f32[2,512], index: 1, kind: input, shape index: {}]   ;;  %s1181_s2 = inlined_call_operand.vmem [shape: f32[32,2], index: 2, kind: input, shape index: {}]   ;;  %s1182_s3 = inlined_call_operand.vmem [shape: f32[32,32], index: 3, kind: input, shape index: {}]   ;;  %s1183_s4 = inlined_call_operand.vmem [shape: f32[8,32], index: 4, kind: input, shape index: {}]   ;;  %s1184_s5 = inlined_call_operand.vmem [shape: f32[32,8], index: 5, kind: input, shape index: {}]   ;;  %s1185_s6 = inlined_call_operand.hbm [shape: f32[1,2], index: 6, kind: output, shape index: {0}]   ;;  %s1186_s7 = inlined_call_operand.vmem [shape: f32[8,512], index: 7, kind: output, shape index: {1}]  }
   0x1   :  { %s13_s26 = sshll.u32 %s1179_s0, 4  ;;  %s14_s26 = int_to_ptr.vmem [resolvable:$true] %s13_s26 }
   0x2   :  { %s851_s27 = scalar_lea.vmem %s14_s26, 16  ;;  %p856_p1 = scmp.lt.s32.totalorder %s14_s26, %s14_s26 }
   0x3   :  { %p852_p0 = scmp.ne.s32.totalorder %s14_s26, %s851_s27  ;;  %p857_p2 = scmp.lt.s32.totalorder %s851_s27, %s851_s27 }
   0x5   :  { %p858_p3 = por %p857_p2, %p856_p1 }
   0x7   :  { %p859_p4 = pnand %p858_p3, %p852_p0 }
   0x9   :  { %862 = shalt.err (!%p859_p4)  }
   0xa   :  { %s889_s28 = smov [#allocation3]  }
   0xb   :  { %16 = dma.vmem_to_smem %s14_s26, 16, %s889_s28, [#allocation2] }
   0xc   :  { %885 = dma.done.wait [#allocation2], 16 }
   0xd   :  { %886 = vsyncadd [#allocation2], 4294967280 }
   0xe   :  { %18 = sfence }
   0xf   :  { %v35_v0 = vld [vmem:[%s1181_s2] sm:$0xff]  ;;  %v890_v2 = vmov 0   ;;  %v36_v3 = vld [vmem:[%s1181_s2 + $0x8] sm:$0xff] }
  0x10   :  { %v948_v1 = vld [vmem:[%s1184_s5] sm:$0xff]  ;;  %830 = vset.pattern.permute.xlu1 %v890_v2  ;;  %829 = vset.pattern.permute.xlu0 %v890_v2  ;;  %v957_v4 = vld [vmem:[%s1184_s5 + $0x8] sm:$0xff] }
  0x11   :  { %42 = vperm.xlu0 %829, %v35_v0   ;;  %99 = vperm.xlu1 %830, %v948_v1  }
  0x12   :  { %19 = vsyncpa [#allocation5], 0  ;;  %v38_v5 = vld [vmem:[%s1181_s2 + $0x18] sm:$0xff]  ;;  %v891_v6 = vmov 1   ;;  %v37_v7 = vld [vmem:[%s1181_s2 + $0x10] sm:$0xff]  ;;  %v892_v10 = vmov 3   ;;  %v61_v13 = vlaneseq }
  0x13   :  { %v969_v8 = vld [vmem:[%s1184_s5 + $0x10] sm:$0xff]  ;;  %v975_v9 = vld [vmem:[%s1184_s5 + $0x18] sm:$0xff]  ;;  %v893_v11 = vmov 2   ;;  %v894_v12 = vmov 0.0   ;;  %vm261_vm0 = vcmask 261120   ;;  %s895_s0 = smov 124  }
  0x14   :  { %338 = vmatprep.mubr.f32.mxu0 %v894_v12  ;;  %427 = vmatprep.mubr.f32.mxu1 %v894_v12  ;;  %v62_v14 = vshrl.u32 %v61_v13, 7  ;;  %v39_v19 = vld [vmem:[%s1180_s1] ss:$2 sm:$0xf]  ;;  %vm686_vm1 = vcmask 15368   ;;  %s774_s10 = sld [smem:[#allocation3 + $0x1]] }
  0x15   :  { %47 = vperm.xlu0 %829, %v36_v3   ;;  %104 = vperm.xlu1 %830, %v957_v4   ;;  %v773_v22 = vld [vmem:[%s1180_s1 + $0x1] ss:$2 sm:$0xf]  ;;  %vm715_vm2 = vcmask 0   ;;  %vm753_vm3 = vcmask 8200  }
  0x16   :  { %v63_v15 = vsub.s32 0, %v62_v14  ;;  %v67_v16 = vsub.s32 1, %v62_v14  ;;  %v71_v20 = vsub.s32 2, %v62_v14  ;;  %v75_v21 = vsub.s32 3, %v62_v14 }
  0x18   :  { %v64_v23 = vrot.slane %v39_v19, %v63_v15  ;;  %v994_v24 = vrot.slane %v39_v19, %v67_v16  ;;  %v997_v29 = vrot.slane %v773_v22, %v63_v15  ;;  %v999_v30 = vrot.slane %v773_v22, %v67_v16 }
  0x19   :  { %57 = vperm.xlu0 %829, %v38_v5   ;;  %831 = vset.pattern.permute.xlu1 %v891_v6  ;;  %v1001_v31 = vrot.slane %v39_v19, %v71_v20  ;;  %v1003_v32 = vrot.slane %v39_v19, %v75_v21  ;;  %v1005_v33 = vrot.slane %v773_v22, %v75_v21 }
  0x1a   :  { %140 = vperm.xlu1 %831, %v36_v3   ;;  %v1011_v38 = vrot.slane %v773_v22, %v71_v20  ;;  %s230_s12 = scvt.s32.f32 %s774_s10 }
  0x1c   :  { %s231_s14 = smul.f32 0.01, %s230_s12 }
  0x1d   :  { %833 = vset.pattern.permute.xlu0 %v891_v6 }
  0x1e   :  { %136 = vperm.xlu0 %833, %v35_v0   ;;  %832 = vset.pattern.permute.xlu1 %v890_v2 }
  0x1f   :  { %52 = vperm.xlu1 %832, %v37_v7  }
  0x22   :  { %144 = vperm.xlu0 %833, %v37_v7  }
  0x23   :  { %109 = vperm.xlu1 %832, %v969_v8  }
  0x26   :  { %836 = vset.pattern.permute.xlu0 %v892_v10 }
  0x27   :  { %114 = vperm.xlu1 %832, %v975_v9   ;;  %250 = vperm.xlu0 %836, %v957_v4  }
  0x2b   :  { %834 = vset.pattern.permute.xlu1 %v891_v6  ;;  %254 = vperm.xlu0 %836, %v969_v8  }
  0x2c   :  { %148 = vperm.xlu1 %834, %v38_v5  }
  0x2f   :  { %839 = vset.pattern.permute.xlu0 %v893_v11 }
  0x30   :  { %835 = vset.pattern.permute.xlu1 %v892_v10  ;;  %461 = vperm.xlu0 %839, %v969_v8  }
  0x31   :  { %246 = vperm.xlu1 %835, %v948_v1  }
  0x35   :  { %837 = vset.pattern.permute.xlu1 %v893_v11 }
  0x36   :  { %453 = vperm.xlu1 %837, %v948_v1  }
  0x3a   :  { %457 = vperm.xlu1 %837, %v957_v4  }
  0x3e   :  { %838 = vset.pattern.permute.xlu1 %v892_v10 }
  0x3f   :  { %258 = vperm.xlu1 %838, %v975_v9  }
  0x43   :  { %840 = vset.pattern.permute.xlu1 %v893_v11 }
  0x44   :  { %465 = vperm.xlu1 %840, %v975_v9  }
  0x90   :  { %v43_v17 = vpop.permute.xlu0 %42  ;;  %v100_v18 = vpop.permute.xlu1 %99 }
  0x91   :  { %v81_v35 = vmul.f32 %v64_v23, %v43_v17  ;;  %v82_v36 = vmul.f32 %v994_v24, %v43_v17  ;;  %v83_v44 = vmul.f32 %v1001_v31, %v43_v17  ;;  %v84_v49 = vmul.f32 %v1003_v32, %v43_v17 }
  0x93   :  { %v117_v50 = vadd.f32 %v100_v18, %v81_v35  ;;  %v118_v54 = vadd.f32 %v100_v18, %v82_v36  ;;  %v119_v59 = vadd.f32 %v100_v18, %v83_v44  ;;  %v120_v17 = vadd.f32 %v100_v18, %v84_v49 }
  0x94   :  { %v48_v25 = vpop.permute.xlu0 %47  ;;  %v105_v26 = vpop.permute.xlu1 %104 }
  0x95   :  { %v85_v27 = vmul.f32 %v64_v23, %v48_v25  ;;  %v86_v28 = vmul.f32 %v994_v24, %v48_v25  ;;  %v88_v37 = vmul.f32 %v1003_v32, %v48_v25  ;;  %v87_v45 = vmul.f32 %v1001_v31, %v48_v25 }
  0x97   :  { %v121_v40 = vadd.f32 %v105_v26, %v85_v27  ;;  %v122_v41 = vadd.f32 %v105_v26, %v86_v28  ;;  %v124_v53 = vadd.f32 %v105_v26, %v88_v37  ;;  %v123_v60 = vadd.f32 %v105_v26, %v87_v45 }
  0x98   :  { %v1007_v34 = vpop.permute.xlu0 %57 }
  0x99   :  { %v141_v39 = vpop.permute.xlu1 %140  ;;  %v93_v13 = vmul.f32 %v64_v23, %v1007_v34 }
  0x9a   :  { %v176_v42 = vmul.f32 %v997_v29, %v141_v39  ;;  %v177_v43 = vmul.f32 %v999_v30, %v141_v39  ;;  %v179_v46 = vmul.f32 %v1005_v33, %v141_v39  ;;  %v178_v51 = vmul.f32 %v1011_v38, %v141_v39 }
  0x9c   :  { %v192_v47 = vadd.f32 %v176_v42, %v121_v40  ;;  %v193_v48 = vadd.f32 %v177_v43, %v122_v41  ;;  %v1023_v62 = vadd.f32 %v179_v46, %v124_v53  ;;  %v1029_v11 = vadd.f32 %v178_v51, %v123_v60 }
  0x9d   :  { %v137_v52 = vpop.permute.xlu0 %136  ;;  %v94_v43 = vmul.f32 %v994_v24, %v1007_v34  ;;  %v95_v51 = vmul.f32 %v1001_v31, %v1007_v34 }
  0x9e   :  { %v172_v55 = vmul.f32 %v997_v29, %v137_v52  ;;  %v173_v56 = vmul.f32 %v999_v30, %v137_v52  ;;  %v174_v57 = vmul.f32 %v1011_v38, %v137_v52  ;;  %v53_v58 = vpop.permute.xlu1 %52  ;;  %v208_v61 = vmax.f32 %v192_v47, 0.0 }
  0x9f   :  { %v209_v63 = vmax.f32 %v193_v48, 0.0  ;;  %v175_v3 = vmul.f32 %v1005_v33, %v137_v52  ;;  %v89_v5 = vmul.f32 %v64_v23, %v53_v58  ;;  %v90_v6 = vmul.f32 %v994_v24, %v53_v58 }
  0xa0   :  { %v188_v0 = vadd.f32 %v172_v55, %v117_v50  ;;  %v189_v2 = vadd.f32 %v173_v56, %v118_v54  ;;  %v1027_v10 = vadd.f32 %v174_v57, %v119_v59  ;;  %v92_v19 = vmul.f32 %v1003_v32, %v53_v58 }
  0xa1   :  { %v145_v7 = vpop.permute.xlu0 %144  ;;  %v673_v20 = vmax.f32 %v208_v61, %v209_v63  ;;  %v1035_v27 = vadd.f32 %v175_v3, %v120_v17  ;;  %v211_v28 = vmax.f32 %v1023_v62, 0.0  ;;  %v210_v35 = vmax.f32 %v1029_v11, 0.0  ;;  %v34_v62 = vld [vmem:[%s1184_s5] sm:$0x1]  ;;  %v244_v11 = vld [vmem:[%s1182_s3 + $0x18] sm:$0xff]  ;;  %s220_s5 = sld [smem:[#allocation3]] }
  0xa2   :  { %v180_v14 = vmul.f32 %v997_v29, %v145_v7  ;;  %v181_v15 = vmul.f32 %v999_v30, %v145_v7  ;;  %v110_v16 = vpop.permute.xlu1 %109  ;;  %v204_v25 = vmax.f32 %v188_v0, 0.0  ;;  %v205_v26 = vmax.f32 %v189_v2, 0.0 }
  0xa3   :  { %v125_v21 = vadd.f32 %v110_v16, %v89_v5  ;;  %v126_v22 = vadd.f32 %v110_v16, %v90_v6  ;;  %674 = vmax.xlane.f32.xlu0 %v673_v20  ;;  %v206_v23 = vmax.f32 %v1027_v10, 0.0  ;;  %v207_v40 = vmax.f32 %v1035_v27, 0.0  ;;  %v242_v20 = vld [vmem:[%s1182_s3 + $0x8] sm:$0xff] }
  0xa4   :  { %v670_v39 = vmax.f32 %v204_v25, %v205_v26  ;;  %v787_v18 = vpack.c.bf16 %v209_v63, %v205_v26  ;;  %v789_v42 = vpack.c.bf16 %v208_v61, %v204_v25  ;;  %v91_v44 = vmul.f32 %v1001_v31, %v53_v58 }
  0xa5   :  { %v196_v36 = vadd.f32 %v180_v14, %v125_v21  ;;  %v197_v37 = vadd.f32 %v181_v15, %v126_v22  ;;  %v183_v45 = vmul.f32 %v1005_v33, %v145_v7  ;;  %v128_v46 = vadd.f32 %v110_v16, %v92_v19  ;;  %v243_v22 = vld [vmem:[%s1182_s3 + $0x10] sm:$0xff] }
  0xa6   :  { %v115_v41 = vpop.permute.xlu1 %114  ;;  %671 = vmax.xlane.f32.xlu1 %v670_v39  ;;  %788 = vmatprep.subr.bf16.mxu0 %v787_v18  ;;  %v795_v47 = vpack.c.bf16 %v211_v28, %v207_v40  ;;  %v797_v48 = vpack.c.bf16 %v210_v35, %v206_v23  ;;  %v96_v24 = vmul.f32 %v1003_v32, %v1007_v34 }
  0xa7   :  { %v212_v49 = vmax.f32 %v196_v36, 0.0  ;;  %v213_v50 = vmax.f32 %v197_v37, 0.0  ;;  %v182_v52 = vmul.f32 %v1011_v38, %v145_v7  ;;  %v127_v53 = vadd.f32 %v110_v16, %v91_v44  ;;  %790 = vmatpush1.bf16.msra.mxu0 %v789_v42  ;;  %s221_s11 = scvt.s32.f32 %s220_s5 }
  0xa8   :  { %796 = vmatprep.subr.bf16.mxu1 %v795_v47  ;;  %v129_v54 = vadd.f32 %v115_v41, %v93_v13  ;;  %v130_v56 = vadd.f32 %v115_v41, %v94_v43  ;;  %v131_v57 = vadd.f32 %v115_v41, %v95_v51  ;;  %v132_v58 = vadd.f32 %v115_v41, %v96_v24 }
  0xa9   :  { %v676_v55 = vmax.f32 %v212_v49, %v213_v50  ;;  %798 = vmatpush1.bf16.msra.mxu1 %v797_v48  ;;  %v199_v60 = vadd.f32 %v183_v45, %v128_v46  ;;  %v198_v63 = vadd.f32 %v182_v52, %v127_v53  ;;  %v720_v21 = vmax.f32 %v210_v35, %v211_v28  ;;  %s222_s13 = smul.f32 0.01, %s221_s11 }
  0xab   :  { %v149_v59 = vpop.permute.xlu1 %148  ;;  %677 = vmax.xlane.f32.xlu0 %v676_v55  ;;  %v215_v6 = vmax.f32 %v199_v60, 0.0  ;;  %v214_v15 = vmax.f32 %v198_v63, 0.0 }
  0xac   :  { %v184_v61 = vmul.f32 %v997_v29, %v149_v59  ;;  %v185_v31 = vmul.f32 %v999_v30, %v149_v59  ;;  %v186_v32 = vmul.f32 %v1011_v38, %v149_v59  ;;  %v187_v34 = vmul.f32 %v1005_v33, %v149_v59  ;;  %v241_v33 = vld [vmem:[%s1182_s3] sm:$0xff]  ;;  %s897_s3 = smov 127  }
  0xad   :  { %v717_v38 = vmax.f32 %v206_v23, %v207_v40  ;;  %v723_v25 = vmax.f32 %v214_v15, %v215_v6  ;;  %v1095_v23 = vpop.permute.xlu0 %250 }
  0xae   :  { %v201_v0 = vadd.f32 %v185_v31, %v130_v56  ;;  %v203_v2 = vadd.f32 %v187_v34, %v132_v58  ;;  %v200_v3 = vadd.f32 %v184_v61, %v129_v54  ;;  %v202_v5 = vadd.f32 %v186_v32, %v131_v57 }
  0xaf   :  { %v896_v34 = vmov 4  }
  0xb0   :  { %v217_v7 = vmax.f32 %v201_v0, 0.0  ;;  %v219_v10 = vmax.f32 %v203_v2, 0.0  ;;  %v216_v13 = vmax.f32 %v200_v3, 0.0  ;;  %v218_v14 = vmax.f32 %v202_v5, 0.0  ;;  %v1093_v27 = vpop.permute.xlu1 %246  ;;  %841 = vset.pattern.permute.xlu1 %v896_v34  ;;  %842 = vset.pattern.permute.xlu0 %v896_v34 }
  0xb1   :  { %v1099_v36 = vpop.permute.xlu0 %254  ;;  %v223_v0 = vstv %s222_s13  ;;  %v236_v3 = vstv %s231_s14 }
  0xb2   :  { %v791_v16 = vpack.c.bf16 %v217_v7, %v213_v50  ;;  %v799_v17 = vpack.c.bf16 %v219_v10, %v215_v6  ;;  %v679_v29 = vmax.f32 %v216_v13, %v217_v7  ;;  %v793_v19 = vpack.c.bf16 %v216_v13, %v212_v49 }
  0xb3   :  { %v801_v30 = vpack.c.bf16 %v218_v14, %v214_v15  ;;  %v726_v26 = vmax.f32 %v218_v14, %v219_v10 }
  0xb4   :  { %792 = vmatprep.subr.bf16.mxu0 %v791_v16  ;;  %800 = vmatprep.subr.bf16.mxu1 %v799_v17 }
  0xb5   :  { %680 = vmax.xlane.f32.xlu1 %v679_v29  ;;  %794 = vmatpush1.bf16.msra.mxu0 %v793_v19  ;;  %v454_v28 = vpop.permute.xlu1 %453  ;;  %v1103_v39 = vpop.permute.xlu0 %461 }
  0xb6   :  { %802 = vmatpush1.bf16.msra.mxu1 %v801_v30  ;;  %v468_v5 = vmul.f32 %v454_v28, %v223_v0  ;;  %v470_v6 = vmul.f32 %v454_v28, %v236_v3  ;;  %v476_v28 = vmul.f32 %v1103_v39, %v223_v0 }
  0xb8   :  { %775 = vmatmul.mubr.msk.f32.vlgmr.msra.gmra.mrb[0].mxu0 %vm261_vm0, %v241_v33 }
  0xb9   :  { %779 = vmatmul.mubr.msk.f32.vlgmr.msra.gmra.mrb[0].mxu1 %vm261_vm0, %v241_v33  ;;  %718 = vmax.xlane.f32.xlu1 %v717_v38  ;;  %v1097_v35 = vpop.permute.xlu1 %457 }
  0xba   :  { %344 = vmatprep.mubr.f32.mxu0 %v894_v12  ;;  %433 = vmatprep.mubr.f32.mxu1 %v894_v12 }
  0xbc   :  { %776 = vmatmul.mubr.msk.f32.gmra.mrb[2].mxu0 %vm261_vm0, %v242_v20 }
  0xbd   :  { %780 = vmatmul.mubr.msk.f32.gmra.mrb[2].mxu1 %vm261_vm0, %v242_v20  ;;  %721 = vmax.xlane.f32.xlu1 %v720_v21  ;;  %v472_v21 = vmul.f32 %v1097_v35, %v223_v0 }
  0xbe   :  { %350 = vmatprep.mubr.f32.mxu0 %v894_v12  ;;  %439 = vmatprep.mubr.f32.mxu1 %v894_v12  ;;  %v1101_v37 = vpop.permute.xlu1 %258 }
  0xc0   :  { %777 = vmatmul.mubr.msk.f32.gmra.mrb[4].mxu0 %vm261_vm0, %v243_v22 }
  0xc1   :  { %781 = vmatmul.mubr.msk.f32.gmra.mrb[4].mxu1 %vm261_vm0, %v243_v22  ;;  %724 = vmax.xlane.f32.xlu1 %v723_v25 }
  0xc2   :  { %356 = vmatprep.mubr.f32.mxu0 %v894_v12  ;;  %445 = vmatprep.mubr.f32.mxu1 %v894_v12 }
  0xc3   :  { %701 = vrot.lane.b32.xlu0 %v34_v62, %s895_s0  ;;  %v1105_v18 = vpop.permute.xlu1 %465 }
  0xc4   :  { %778 = vmatmul.mubr.msk.f32.gmra.mrb[6].mxu0 %vm261_vm0, %v244_v11 }
  0xc5   :  { %782 = vmatmul.mubr.msk.f32.gmra.mrb[6].mxu1 %vm261_vm0, %v244_v11  ;;  %727 = vmax.xlane.f32.xlu1 %v726_v26  ;;  %v474_v26 = vmul.f32 %v1097_v35, %v236_v3 }
  0xc6   :  { %588 = vmatprep.mubr.f32.mxu0 %v894_v12  ;;  %659 = vmatprep.mubr.f32.mxu1 %v894_v12 }
  0xd6   :  { %518 = vperm.xlu1 %841, %v948_v1  }
 0x130   :  { %v675_v40 = vpop.xlane.xlu0 %674 }
 0x131   :  { %v683_v43 = vmul.f32 %v675_v40, %v957_v4 }
 0x133   :  { %v672_v41 = vpop.xlane.xlu1 %671  ;;  %v688_v46 = vsel %vm686_vm1, %v683_v43, 0.0 }
 0x134   :  { %v682_v12 = vmul.f32 %v672_v41, %v948_v1 }
 0x136   :  { %v687_v45 = vsel %vm686_vm1, %v682_v12, 0.0  ;;  %v480_v12 = vmul.f32 %v1105_v18, %v223_v0 }
 0x137   :  { %v689_v48 = vadd.f32 %v688_v46, %v687_v45 }
 0x138   :  { %v678_v42 = vpop.xlane.xlu0 %677 }
 0x139   :  { %v684_v44 = vmul.f32 %v678_v42, %v969_v8 }
 0x13b   :  { %v690_v47 = vsel %vm686_vm1, %v684_v44, 0.0 }
 0x13c   :  { %v691_v51 = vadd.f32 %v690_v47, %v689_v48  ;;  %v1115_v58 = vpop.permute.xlu0 %701 }
 0x142   :  { %v681_v49 = vpop.xlane.xlu1 %680 }
 0x143   :  { %v685_v50 = vmul.f32 %v681_v49, %v975_v9 }
 0x145   :  { %v692_v24 = vsel %vm686_vm1, %v685_v50, 0.0 }
 0x146   :  { %v693_v52 = vadd.f32 %v692_v24, %v691_v51  ;;  %v719_v2 = vpop.xlane.xlu1 %718 }
 0x148   :  { %v694_v53 = vrot.slane %v693_v52, 4 }
 0x14a   :  { %v695_v54 = vadd.f32 %v694_v53, %v693_v52  ;;  %v722_v15 = vpop.xlane.xlu1 %721 }
 0x14b   :  { %v730_v34 = vmul.f32 %v722_v15, %v957_v4 }
 0x14c   :  { %v696_v55 = vrot.slane %v695_v54, 2 }
 0x14e   :  { %v697_v56 = vadd.f32 %v696_v55, %v695_v54  ;;  %v725_v45 = vpop.xlane.xlu1 %724 }
 0x150   :  { %v698_v57 = vrot.slane %v697_v56, 1 }
 0x152   :  { %v699_v59 = vadd.f32 %v698_v57, %v697_v56 }
 0x154   :  { %v704_v60 = vadd.f32 %v1115_v58, %v699_v59 }
 0x156   :  { %v785_v61 = vmul.f32 -1.442695, %v704_v60 }
 0x158   :  { %843 = vpow2.f32 %v785_v61 }
 0x162   :  { %v844_v31 = vpop.eup %843 }
 0x163   :  { %v708_v32 = vadd.f32 1.0, %v844_v31 }
 0x165   :  { %845 = vrcp.f32 %v708_v32  ;;  %v482_v32 = vmul.f32 %v1105_v18, %v236_v3 }
 0x16f   :  { %v846_v63 = vpop.eup %845 }
 0x170   :  { %712 = vrot.lane.b32.xlu0 %v846_v63, %s897_s3 }
 0x18b   :  { %v340_v7 = vpop.f32.mrb[0].mxu0 }
 0x18c   :  { %v341_v10 = vadd.f32 %v340_v7, %v1093_v27  ;;  %v429_v13 = vpop.f32.mrb[0].mxu1  ;;  %v342_v14 = vpop.f32.mrb[1].mxu0 }
 0x18d   :  { %v430_v16 = vadd.f32 %v429_v13, %v1093_v27  ;;  %v343_v17 = vadd.f32 %v342_v14, %v1093_v27  ;;  %v431_v29 = vpop.f32.mrb[1].mxu1 }
 0x18e   :  { %v484_v19 = vadd.f32 %v468_v5, %v341_v10  ;;  %v432_v30 = vadd.f32 %v431_v29, %v1093_v27  ;;  %v478_v27 = vmul.f32 %v1103_v39, %v236_v3 }
 0x18f   :  { %v486_v33 = vadd.f32 %v470_v6, %v430_v16  ;;  %v485_v38 = vadd.f32 %v468_v5, %v343_v17  ;;  %v346_v20 = vpop.f32.mrb[2].mxu0  ;;  %v728_v17 = vpop.xlane.xlu1 %727 }
 0x190   :  { %v487_v22 = vadd.f32 %v470_v6, %v432_v30  ;;  %v347_v25 = vadd.f32 %v346_v20, %v1095_v23  ;;  %v435_v62 = vpop.f32.mrb[2].mxu1  ;;  %v348_v11 = vpop.f32.mrb[3].mxu0  ;;  %v500_v46 = vmax.f32 %v484_v19, 0.0  ;;  %v729_v6 = vmul.f32 %v719_v2, %v948_v1 }
 0x191   :  { %v436_v40 = vadd.f32 %v435_v62, %v1095_v23  ;;  %v349_v41 = vadd.f32 %v348_v11, %v1095_v23  ;;  %v437_v42 = vpop.f32.mrb[3].mxu1  ;;  %v502_v47 = vmax.f32 %v486_v33, 0.0  ;;  %v501_v50 = vmax.f32 %v485_v38, 0.0 }
 0x192   :  { %v488_v43 = vadd.f32 %v472_v21, %v347_v25  ;;  %v438_v44 = vadd.f32 %v437_v42, %v1095_v23  ;;  %v503_v59 = vmax.f32 %v487_v22, 0.0  ;;  %v734_v1 = vsel %vm686_vm1, %v730_v34, 0.0 }
 0x193   :  { %v490_v48 = vadd.f32 %v474_v26, %v436_v40  ;;  %v489_v49 = vadd.f32 %v472_v21, %v349_v41  ;;  %v352_v35 = vpop.f32.mrb[4].mxu0  ;;  %v731_v2 = vmul.f32 %v725_v45, %v969_v8  ;;  %v732_v20 = vmul.f32 %v728_v17, %v975_v9 }
 0x194   :  { %v504_v51 = vmax.f32 %v488_v43, 0.0  ;;  %v491_v24 = vadd.f32 %v474_v26, %v438_v44  ;;  %v353_v52 = vadd.f32 %v352_v35, %v1099_v36  ;;  %v441_v53 = vpop.f32.mrb[4].mxu1  ;;  %v354_v54 = vpop.f32.mrb[5].mxu0  ;;  %v733_v42 = vsel %vm686_vm1, %v729_v6, 0.0 }
 0x195   :  { %v506_v55 = vmax.f32 %v490_v48, 0.0  ;;  %v505_v39 = vmax.f32 %v489_v49, 0.0  ;;  %v442_v56 = vadd.f32 %v441_v53, %v1099_v36  ;;  %v355_v57 = vadd.f32 %v354_v54, %v1099_v36  ;;  %v443_v23 = vpop.f32.mrb[5].mxu1 }
 0x196   :  { %v805_v60 = vpack.c.bf16 %v504_v51, %v500_v46  ;;  %v507_v61 = vmax.f32 %v491_v24, 0.0  ;;  %v444_v31 = vadd.f32 %v443_v23, %v1099_v36  ;;  %v492_v7 = vadd.f32 %v476_v28, %v353_v52  ;;  %v516_v46 = vld [vmem:[%s1183_s4] sm:$0xff]  ;;  %s898_s4 = smov [#allocation4]  }
 0x197   :  { %v813_v63 = vpack.c.bf16 %v506_v55, %v502_v47  ;;  %v358_v0 = vpop.f32.mrb[6].mxu0  ;;  %v803_v5 = vpack.c.bf16 %v505_v39, %v501_v50  ;;  %v494_v29 = vadd.f32 %v478_v27, %v442_v56  ;;  %v493_v19 = vadd.f32 %v476_v28, %v355_v57  ;;  %s761_s17 = sshll.u32 %s898_s4, 4  ;;  %s762_s17 = int_to_ptr.vmem [resolvable:$true] %s761_s17 }
 0x198   :  { %v359_v10 = vadd.f32 %v358_v0, %v1101_v37  ;;  %v447_v13 = vpop.f32.mrb[6].mxu1  ;;  %v360_v14 = vpop.f32.mrb[7].mxu0  ;;  %v811_v16 = vpack.c.bf16 %v507_v61, %v503_v59  ;;  %v495_v4 = vadd.f32 %v478_v27, %v444_v31  ;;  %v508_v21 = vmax.f32 %v492_v7, 0.0  ;;  %s863_s18 = scalar_lea.vmem %s762_s17, 16  ;;  %s867_s19 = scalar_lea.vmem %s762_s17, 32 }
 0x199   :  { %v448_v36 = vadd.f32 %v447_v13, %v1101_v37  ;;  %v361_v18 = vadd.f32 %v360_v14, %v1101_v37  ;;  %v449_v3 = vpop.f32.mrb[7].mxu1  ;;  %804 = vmatprep.subr.bf16.mxu0 %v803_v5  ;;  %v510_v62 = vmax.f32 %v494_v29, 0.0  ;;  %v509_v11 = vmax.f32 %v493_v19, 0.0  ;;  %p864_p5 = scmp.ne.s32.totalorder %s762_s17, %s863_s18  ;;  %p868_p6 = scmp.lt.s32.totalorder %s762_s17, %s762_s17 }
 0x19a   :  { %v496_v15 = vadd.f32 %v480_v12, %v359_v10  ;;  %v450_v30 = vadd.f32 %v449_v3, %v1101_v37  ;;  %812 = vmatprep.subr.bf16.mxu1 %v811_v16  ;;  %806 = vmatpush1.bf16.msra.mxu0 %v805_v60  ;;  %v511_v40 = vmax.f32 %v495_v4, 0.0  ;;  %v736_v27 = vsel %vm686_vm1, %v731_v2, 0.0  ;;  %p869_p7 = scmp.lt.s32.totalorder %s867_s19, %s863_s18 }
 0x19b   :  { %v498_v33 = vadd.f32 %v482_v32, %v448_v36  ;;  %v497_v38 = vadd.f32 %v480_v12, %v361_v18  ;;  %814 = vmatpush1.bf16.msra.mxu1 %v813_v63  ;;  %v735_v12 = vadd.f32 %v734_v1, %v733_v42  ;;  %v738_v9 = vsel %vm686_vm1, %v732_v20, 0.0 }
 0x19c   :  { %v512_v22 = vmax.f32 %v496_v15, 0.0  ;;  %v499_v25 = vadd.f32 %v482_v32, %v450_v30  ;;  %p870_p8 = por %p869_p7, %p868_p6 }
 0x19d   :  { %v514_v26 = vmax.f32 %v498_v33, 0.0  ;;  %v513_v28 = vmax.f32 %v497_v38, 0.0  ;;  %v737_v45 = vadd.f32 %v736_v27, %v735_v12 }
 0x19e   :  { %v809_v37 = vpack.c.bf16 %v512_v22, %v508_v21  ;;  %v515_v41 = vmax.f32 %v499_v25, 0.0  ;;  %p871_p9 = pnand %p870_p8, %p864_p5 }
 0x19f   :  { %v817_v8 = vpack.c.bf16 %v514_v26, %v510_v62  ;;  %v807_v43 = vpack.c.bf16 %v513_v28, %v509_v11  ;;  %v739_v47 = vadd.f32 %v738_v9, %v737_v45 }
 0x1a0   :  { %v815_v44 = vpack.c.bf16 %v515_v41, %v511_v40 }
 0x1a1   :  { %808 = vmatprep.subr.bf16.mxu0 %v807_v43  ;;  %v740_v48 = vrot.slane %v739_v47, 4 }
 0x1a2   :  { %816 = vmatprep.subr.bf16.mxu1 %v815_v44  ;;  %810 = vmatpush1.bf16.msra.mxu0 %v809_v37 }
 0x1a3   :  { %818 = vmatpush1.bf16.msra.mxu1 %v817_v8  ;;  %v741_v49 = vadd.f32 %v740_v48, %v739_v47 }
 0x1a5   :  { %783 = vmatmul.mubr.msk.f32.vlgmr.msra.gmra.mrb[8].mxu0 %vm261_vm0, %v516_v46  ;;  %v742_v35 = vrot.slane %v741_v49, 2 }
 0x1a6   :  { %784 = vmatmul.mubr.msk.f32.vlgmr.msra.gmra.mrb[8].mxu1 %vm261_vm0, %v516_v46 }
 0x1a7   :  { %v743_v50 = vadd.f32 %v742_v35, %v741_v49 }
 0x1a9   :  { %v744_v51 = vrot.slane %v743_v50, 1 }
 0x1ab   :  { %v745_v24 = vadd.f32 %v744_v51, %v743_v50 }
 0x1ad   :  { %v746_v52 = vadd.f32 %v745_v24, %v1115_v58 }
 0x1af   :  { %v786_v53 = vmul.f32 -1.442695, %v746_v52 }
 0x1b1   :  { %847 = vpow2.f32 %v786_v53 }
 0x1bb   :  { %v848_v54 = vpop.eup %847 }
 0x1bc   :  { %v750_v55 = vadd.f32 1.0, %v848_v54 }
 0x1be   :  { %849 = vrcp.f32 %v750_v55 }
 0x1c8   :  { %v850_v56 = vpop.eup %849 }
 0x1e2   :  { %v713_v39 = vpop.permute.xlu0 %712 }
 0x1e3   :  { %716 = vst.msk [vmem:[#allocation4] sm:$0x1] %vm715_vm2, %v713_v39 }
 0x1e4   :  { %754 = vst.msk [vmem:[#allocation4] sm:$0x1] %vm753_vm3, %v850_v56 }
 0x1e5   :  { %874 = shalt.err (!%p871_p9)
}
 0x1e6   :  { %s875_s21 = scalar_lea.hbm %s1185_s6, 16 }
 0x1e7   :  { %p876_p10 = scmp.ne.s32.totalorder %s1185_s6, %s875_s21  ;;  %p879_p11 = scmp.lt.u32.totalorder %s875_s21, %s1185_s6 }
 0x1e9   :  { %p881_p12 = pnand %p879_p11, %p876_p10 }
 0x1eb   :  { %884 = shalt.err (!%p881_p12)
}
 0x1ec   :  { %764 = dma.vmem_to_hbm [thread:$0]  %s762_s17, 16, %s1185_s6, [#allocation5]   ;;  %v519_v58 = vpop.permute.xlu1 %518 }
 0x278   :  { %v590_v57 = vpop.f32.mrb[8].mxu0 }
 0x279   :  { %v661_v23 = vpop.f32.mrb[8].mxu1  ;;  %v592_v59 = vpop.f32.mrb[9].mxu0  ;;  %v591_v60 = vadd.f32 %v590_v57, %v519_v58 }
 0x27a   :  { %v663_v61 = vpop.f32.mrb[9].mxu1  ;;  %v593_v31 = vadd.f32 %v592_v59, %v519_v58  ;;  %v662_v32 = vadd.f32 %v661_v23, %v519_v58 }
 0x27b   :  { %v664_v34 = vadd.f32 %v663_v61, %v519_v58  ;;  %666 = vst [vmem:[%s1186_s7] sm:$0xff] %v591_v60 }
 0x27c   :  { %667 = vst [vmem:[%s1186_s7 + $0x8] sm:$0xff] %v593_v31  ;;  %668 = vst [vmem:[%s1186_s7 + $0x10] sm:$0xff] %v662_v32 }
 0x27d   :  { %669 = vst [vmem:[%s1186_s7 + $0x18] sm:$0xff] %v664_v34 }
 0x27e   :  { %887 = dma.done.wait [#allocation5], 16  }
 0x27f   :  { %888 = vsyncadd [#allocation5], 4294967280 }
 0x280   :  { %772 = vsyncpa [#allocation5], 1 }

</bundles_post_ra>
